<compile_context>
chip_gen: v7x
topology: tpu7x:2x2x1
jax: 0.10.0
libtpu: 0.0.40
codegen_flags: <defaults>
</compile_context>

<pallas_src>
import functools

import jax
import jax.numpy as jnp
import numpy as np
from jax.experimental import pallas as pl
from jax.experimental.pallas import tpu as pltpu


def _sep_dw_kernel(x_ref, a_ref, s1_ref, p_ref, s2_ref, o_ref, *, stride, th):
    # x_ref : (1, Hp, Kc)        bf16 padded input, fused+lane-padded (W,C) axis
    # a_ref : (3*Kc, Wo*Cin)     bf16 K-stacked banded depthwise matrix (BN1 folded)
    # s1_ref: (1, Wo*Cin)        f32 folded bias1 + BN1 shift
    # p_ref : (Wo*Cin, Wo*Cout)  bf16 block-diagonal pointwise matrix (BN2 folded)
    # s2_ref: (1, Wo*Cout)       f32 folded bias2 + BN2 shift
    # o_ref : (1, th, Wo*Cout)   lane-dense output row tile
    i = pl.program_id(1)
    row0 = i * (th * stride)
    if (th * stride) % 8 == 0:
        row0 = pl.multiple_of(row0, 8)

    # One contiguous row-window load per step; the kh taps and the H-stride
    # selection are taken from the loaded value (no repeated strided loads).
    win = x_ref[0, pl.ds(row0, th * stride + 2), :]           # (th*stride+2, Kc)
    span = (th - 1) * stride + 1
    taps = [jax.lax.slice_in_dim(win, kh, kh + span, stride, axis=0)
            for kh in range(3)]
    rows_cat = jnp.concatenate(taps, axis=-1)                 # (th, 3*Kc) bf16

    # Depthwise 3x3 (kw taps + W-stride live in the band structure) as ONE
    # bf16 MXU matmul with f32 accumulation.
    acc = jnp.dot(rows_cat, a_ref[...], preferred_element_type=jnp.float32)
    # stage 1: folded (conv bias + BN1) shift, ReLU6
    y = jnp.clip(acc + s1_ref[...], 0.0, 6.0)                 # (th, Wo*Cin) f32

    # stage 2: 1x1 conv as block-diagonal matmul -> lane-dense (th, Wo*Cout)
    y2 = jnp.dot(y.astype(jnp.bfloat16), p_ref[...],
                 preferred_element_type=jnp.float32)
    o_ref[0] = jnp.clip(y2 + s2_ref[...], 0.0, 6.0).astype(o_ref.dtype)


def separable_depthwise_conv(x_nchw, params, *, stride=1, eps=1e-5):
    """Forward pass of SeprableDepthwiseConv. x_nchw: (B, Cin, H, W)."""
    B, Cin, H, W = x_nchw.shape
    Hp, Wp = H + 2, W + 2
    Ho = (H + 2 - 3) // stride + 1
    Wo = (W + 2 - 3) // stride + 1
    Cout = params["pw_w"].shape[0]
    f32, bf16 = jnp.float32, jnp.bfloat16

    # Lane-pad the fused (W, C) axis to a multiple of 128 so the in-kernel
    # K-axis concat is lane-tile aligned and input loads are lane-dense.
    Kc = 128 * ((Wp * Cin + 127) // 128)

    # ---- fold conv biases + BatchNorm (inference) into weights / shifts ----
    # NOTE: hoist this block out of the per-forward trace when params are static.
    s1 = params["bn1_gamma"] / jnp.sqrt(params["bn1_var"] + eps)
    t1 = params["bn1_beta"] - s1 * params["bn1_mean"]
    s2 = params["bn2_gamma"] / jnp.sqrt(params["bn2_var"] + eps)
    t2 = params["bn2_beta"] - s2 * params["bn2_mean"]
    dwf = params["dw_w"][:, 0].astype(f32) * s1[:, None, None]        # (Cin,3,3)
    shift1 = (t1 + s1 * params["dw_b"]).astype(f32)                   # (Cin,)
    pwf = (params["pw_w"][:, :, 0, 0] * s2[:, None]).T.astype(f32)    # (Cin,Cout)
    shift2 = (t2 + s2 * params["pw_b"]).astype(f32)                   # (Cout,)

    # Banded depthwise matrices:
    # A[kh, wp*Cin+c, wo*Cin+c] = dwf[c, kh, wp - stride*wo] if 0<=wp-stride*wo<=2.
    wp_i = jnp.arange(Wp)
    wo_i = jnp.arange(Wo)
    kw_off = wp_i[:, None] - stride * wo_i[None, :]                   # (Wp, Wo)
    valid = (kw_off >= 0) & (kw_off <= 2)
    taps = jnp.where(valid[None, None], dwf[:, :, jnp.clip(kw_off, 0, 2)], 0.0)
    a_mats = jnp.einsum("ckpw,cd->kpcwd", taps, jnp.eye(Cin, dtype=f32))
    a_mats = a_mats.reshape(3, Wp * Cin, Wo * Cin)
    a_mats = jnp.pad(a_mats, ((0, 0), (0, Kc - Wp * Cin), (0, 0)))
    a_cat = a_mats.reshape(3 * Kc, Wo * Cin).astype(bf16)             # K-stacked

    # Block-diagonal pointwise matrix: P[wo*Cin+ci, wo*Cout+co] = pwf[ci, co].
    p_mat = jnp.einsum("wv,cd->wcvd", jnp.eye(Wo, dtype=f32), pwf)
    p_mat = p_mat.reshape(Wo * Cin, Wo * Cout).astype(bf16)

    shift1_t = jnp.tile(shift1, Wo)[None, :]                          # (1, Wo*Cin)
    shift2_t = jnp.tile(shift2, Wo)[None, :]                          # (1, Wo*Cout)

    # Gate the banded/block-diagonal formulation to small W*C.
    mat_bytes = 2 * (3 * Kc * Wo * Cin + Wo * Cin * Wo * Cout)
    assert mat_bytes < 8 * 1024 * 1024, "banded formulation only for small W*C"

    # ---- input layout: NCHW -> padded NHWC -> fused, lane-padded, bf16 ----
    x2 = jnp.pad(jnp.transpose(x_nchw, (0, 2, 3, 1)),
                 ((0, 0), (1, 1), (1, 1), (0, 0))).reshape(B, Hp, Wp * Cin)
    x2 = jnp.pad(x2, ((0, 0), (0, 0), (0, Kc - Wp * Cin))).astype(bf16)

    # Row tiling: whole output height per step when Ho<=256, else the largest
    # divisor <=256.  Keep >=2 parallel grid steps (v7x has 2 TensorCores).
    th = max(d for d in range(1, min(Ho, 256) + 1) if Ho % d == 0)
    n_h = Ho // th
    if B == 1 and n_h == 1 and Ho % 2 == 0:
        th, n_h = Ho // 2, 2

    kernel = functools.partial(_sep_dw_kernel, stride=stride, th=th)
    out2d = pl.pallas_call(
        kernel,
        out_shape=jax.ShapeDtypeStruct((B, Ho, Wo * Cout), x_nchw.dtype),
        grid_spec=pltpu.PrefetchScalarGridSpec(
            num_scalar_prefetch=0,
            grid=(B, n_h),
            in_specs=[
                # input + weights stay resident across the row-tile axis
                pl.BlockSpec((1, Hp, Kc), lambda b, i: (b, 0, 0)),
                pl.BlockSpec((3 * Kc, Wo * Cin), lambda b, i: (0, 0)),
                pl.BlockSpec((1, Wo * Cin), lambda b, i: (0, 0)),
                pl.BlockSpec((Wo * Cin, Wo * Cout), lambda b, i: (0, 0)),
                pl.BlockSpec((1, Wo * Cout), lambda b, i: (0, 0)),
            ],
            out_specs=pl.BlockSpec((1, th, Wo * Cout), lambda b, i: (b, i, 0)),
        ),
        compiler_params=pltpu.CompilerParams(
            dimension_semantics=("parallel", "parallel"),
            vmem_limit_bytes=32 * 1024 * 1024),
    )(x2, a_cat, shift1_t, p_mat, shift2_t)

    # (B, Ho, Wo*Cout) -> (B, Ho, Wo, Cout) is a free reshape; transpose to NCHW
    # to match the PyTorch module (return NHWC instead if the consumer allows).
    return jnp.transpose(out2d.reshape(B, Ho, Wo, Cout), (0, 3, 1, 2))


def _reference(x_nchw, params, *, stride=1, eps=1e-5):
    """Pure-JAX reference (NCHW, mirrors the PyTorch forward in eval mode)."""
    Cin = params["dw_w"].shape[0]
    y = jax.lax.conv_general_dilated(
        x_nchw, params["dw_w"], (stride, stride), ((1, 1), (1, 1)),
        dimension_numbers=("NCHW", "OIHW", "NCHW"), feature_group_count=Cin)
    y = y + params["dw_b"][None, :, None, None]
    s1 = params["bn1_gamma"] / jnp.sqrt(params["bn1_var"] + eps)
    t1 = params["bn1_beta"] - s1 * params["bn1_mean"]
    y = jnp.clip(y * s1[None, :, None, None] + t1[None, :, None, None], 0., 6.)
    y = jax.lax.conv_general_dilated(
        y, params["pw_w"], (1, 1), ((0, 0), (0, 0)),
        dimension_numbers=("NCHW", "OIHW", "NCHW"))
    y = y + params["pw_b"][None, :, None, None]
    s2 = params["bn2_gamma"] / jnp.sqrt(params["bn2_var"] + eps)
    t2 = params["bn2_beta"] - s2 * params["bn2_mean"]
    return jnp.clip(y * s2[None, :, None, None] + t2[None, :, None, None], 0., 6.)


if __name__ == "__main__":
    B, CH_IN, CH_OUT, H, W = 2, 8, 16, 16, 16
    STRIDE, USE_BIAS = 1, True

    key = jax.random.PRNGKey(0)
    ks = jax.random.split(key, 12)
    params = {
        "dw_w": 0.2 * jax.random.normal(ks[0], (CH_IN, 1, 3, 3), jnp.float32),
        "dw_b": (0.1 * jax.random.normal(ks[1], (CH_IN,), jnp.float32)
                 if USE_BIAS else jnp.zeros((CH_IN,), jnp.float32)),
        "pw_w": 0.2 * jax.random.normal(ks[2], (CH_OUT, CH_IN, 1, 1), jnp.float32),
        "pw_b": (0.1 * jax.random.normal(ks[3], (CH_OUT,), jnp.float32)
                 if USE_BIAS else jnp.zeros((CH_OUT,), jnp.float32)),
        "bn1_gamma": 1.0 + 0.1 * jax.random.normal(ks[4], (CH_IN,), jnp.float32),
        "bn1_beta": 0.1 * jax.random.normal(ks[5], (CH_IN,), jnp.float32),
        "bn1_mean": 0.1 * jax.random.normal(ks[6], (CH_IN,), jnp.float32),
        "bn1_var": jnp.abs(jax.random.normal(ks[7], (CH_IN,), jnp.float32)) + 0.5,
        "bn2_gamma": 1.0 + 0.1 * jax.random.normal(ks[8], (CH_OUT,), jnp.float32),
        "bn2_beta": 0.1 * jax.random.normal(ks[9], (CH_OUT,), jnp.float32),
        "bn2_mean": 0.1 * jax.random.normal(ks[10], (CH_OUT,), jnp.float32),
        "bn2_var": jnp.abs(jax.random.normal(ks[11], (CH_OUT,), jnp.float32)) + 0.5,
    }

    x = jax.random.normal(jax.random.PRNGKey(1), (B, CH_IN, H, W), jnp.float32)

    out = separable_depthwise_conv(x, params, stride=STRIDE)
    out = jax.block_until_ready(out)

    ref = jax.block_until_ready(_reference(x, params, stride=STRIDE))
    assert out.shape == (B, CH_OUT, H // STRIDE, W // STRIDE)
    # bf16 MXU inputs (two chained matmuls) -> bf16-level tolerance.
    np.testing.assert_allclose(np.asarray(out), np.asarray(ref),
                               rtol=5e-2, atol=5e-2)
    print("KERNEL_OK")
</pallas_src>

<mosaic_0001>
module attributes {stable_mosaic.version = 11 : i64} {
  func.func @_sep_dw_kernel(%arg0: i32, %arg1: i32, %arg2: memref<1x18x256xbf16, #tpu.memory_space<vmem>>, %arg3: memref<768x128xbf16, #tpu.memory_space<vmem>>, %arg4: memref<1x128xf32, #tpu.memory_space<vmem>>, %arg5: memref<128x256xbf16, #tpu.memory_space<vmem>>, %arg6: memref<1x256xf32, #tpu.memory_space<vmem>>, %arg7: memref<1x16x256xf32, #tpu.memory_space<vmem>>) attributes {dimension_semantics = [#tpu.dimension_semantics<parallel>, #tpu.dimension_semantics<parallel>], iteration_bounds = array<i64: 2, 1>, scalar_prefetch = 0 : i64, scratch_operands = 0 : i64, tpu.core_type = #tpu.core_type<tc>, window_params = [{transform_indices = @transform_0, window_bounds = array<i64: 1, 18, 256>}, {pipeline_mode = #tpu.pipeline_mode<synchronous>, transform_indices = @transform_1, window_bounds = array<i64: 768, 128>}, {pipeline_mode = #tpu.pipeline_mode<synchronous>, transform_indices = @transform_2, window_bounds = array<i64: 1, 128>}, {pipeline_mode = #tpu.pipeline_mode<synchronous>, transform_indices = @transform_3, window_bounds = array<i64: 128, 256>}, {pipeline_mode = #tpu.pipeline_mode<synchronous>, transform_indices = @transform_4, window_bounds = array<i64: 1, 256>}, {transform_indices = @transform_5, window_bounds = array<i64: 1, 16, 256>}]} {
    %c16_i32 = arith.constant 16 : i32
    %0 = arith.muli %arg1, %c16_i32 : i32
    %1 = tpu.assume_multiple %0, 8 : i32
    %c0 = arith.constant 0 : index
    %2 = arith.index_cast %1 : i32 to index
    %c0_0 = arith.constant 0 : index
    %3 = vector.load %arg2[%c0, %2, %c0_0] : memref<1x18x256xbf16, #tpu.memory_space<vmem>>, vector<1x18x256xbf16>
    %4 = vector.shape_cast %3 : vector<1x18x256xbf16> to vector<18x256xbf16>
    %5 = vector.extract_strided_slice %4 {offsets = [0, 0], sizes = [16, 256], strides = [1, 1]} : vector<18x256xbf16> to vector<16x256xbf16>
    %6 = vector.extract_strided_slice %4 {offsets = [1, 0], sizes = [16, 256], strides = [1, 1]} : vector<18x256xbf16> to vector<16x256xbf16>
    %7 = vector.extract_strided_slice %4 {offsets = [2, 0], sizes = [16, 256], strides = [1, 1]} : vector<18x256xbf16> to vector<16x256xbf16>
    %8 = tpu.concatenate %5, %6, %7 in 1 : vector<16x256xbf16>, vector<16x256xbf16>, vector<16x256xbf16> -> vector<16x768xbf16>
    %c0_1 = arith.constant 0 : index
    %c0_2 = arith.constant 0 : index
    %9 = vector.load %arg3[%c0_1, %c0_2] : memref<768x128xbf16, #tpu.memory_space<vmem>>, vector<768x128xbf16>
    %cst = arith.constant dense<0.000000e+00> : vector<16x128xf32>
    %10 = tpu.matmul %8, %9, %cst {dimension_numbers = #tpu.dot_dimension_numbers<[1], [0], [0], [1], [0, 0, 1, 1], [], []>} : vector<16x768xbf16>, vector<768x128xbf16>, vector<16x128xf32> -> vector<16x128xf32>
    %c0_3 = arith.constant 0 : index
    %c0_4 = arith.constant 0 : index
    %11 = vector.load %arg4[%c0_3, %c0_4] : memref<1x128xf32, #tpu.memory_space<vmem>>, vector<1x128xf32>
    %12 = vector.broadcast %11 : vector<1x128xf32> to vector<16x128xf32>
    %13 = arith.addf %10, %12 : vector<16x128xf32>
    %cst_5 = arith.constant 0.000000e+00 : f32
    %cst_6 = arith.constant 6.000000e+00 : f32
    %14 = vector.broadcast %cst_5 : f32 to vector<16x128xf32>
    %15 = arith.maximumf %14, %13 : vector<16x128xf32>
    %16 = vector.broadcast %cst_6 : f32 to vector<16x128xf32>
    %17 = arith.minimumf %16, %15 : vector<16x128xf32>
    %18 = arith.truncf %17 : vector<16x128xf32> to vector<16x128xbf16>
    %c0_7 = arith.constant 0 : index
    %c0_8 = arith.constant 0 : index
    %19 = vector.load %arg5[%c0_7, %c0_8] : memref<128x256xbf16, #tpu.memory_space<vmem>>, vector<128x256xbf16>
    %cst_9 = arith.constant dense<0.000000e+00> : vector<16x256xf32>
    %20 = tpu.matmul %18, %19, %cst_9 {dimension_numbers = #tpu.dot_dimension_numbers<[1], [0], [0], [1], [0, 0, 1, 1], [], []>} : vector<16x128xbf16>, vector<128x256xbf16>, vector<16x256xf32> -> vector<16x256xf32>
    %c0_10 = arith.constant 0 : index
    %c0_11 = arith.constant 0 : index
    %21 = vector.load %arg6[%c0_10, %c0_11] : memref<1x256xf32, #tpu.memory_space<vmem>>, vector<1x256xf32>
    %22 = vector.broadcast %21 : vector<1x256xf32> to vector<16x256xf32>
    %23 = arith.addf %20, %22 : vector<16x256xf32>
    %cst_12 = arith.constant 0.000000e+00 : f32
    %cst_13 = arith.constant 6.000000e+00 : f32
    %24 = vector.broadcast %cst_12 : f32 to vector<16x256xf32>
    %25 = arith.maximumf %24, %23 : vector<16x256xf32>
    %26 = vector.broadcast %cst_13 : f32 to vector<16x256xf32>
    %27 = arith.minimumf %26, %25 : vector<16x256xf32>
    %c0_14 = arith.constant 0 : index
    %c0_15 = arith.constant 0 : index
    %c0_16 = arith.constant 0 : index
    %28 = vector.load %arg7[%c0_14, %c0_15, %c0_16] : memref<1x16x256xf32, #tpu.memory_space<vmem>>, vector<1x16x256xf32>
    %29 = vector.shape_cast %28 : vector<1x16x256xf32> to vector<16x256xf32>
    %30 = vector.shape_cast %27 : vector<16x256xf32> to vector<1x16x256xf32>
    tpu.vector_store %arg7[%c0_14, %c0_15, %c0_16], %30 {strides = array<i32>} : memref<1x16x256xf32, #tpu.memory_space<vmem>>, vector<1x16x256xf32>,
    return
  }
  func.func @transform_0(%arg0: i32, %arg1: i32) -> (i32, i32, i32) {
    %c0_i32 = arith.constant 0 : i32
    %c0_i32_0 = arith.constant 0 : i32
    %c0_i32_1 = arith.constant 0 : i32
    return %arg0, %c0_i32, %c0_i32_0 : i32, i32, i32
  }
  func.func @transform_1(%arg0: i32, %arg1: i32) -> (i32, i32) {
    %c0_i32 = arith.constant 0 : i32
    %c0_i32_0 = arith.constant 0 : i32
    %c0_i32_1 = arith.constant 0 : i32
    return %c0_i32, %c0_i32_0 : i32, i32
  }
  func.func @transform_2(%arg0: i32, %arg1: i32) -> (i32, i32) {
    %c0_i32 = arith.constant 0 : i32
    %c0_i32_0 = arith.constant 0 : i32
    %c0_i32_1 = arith.constant 0 : i32
    return %c0_i32, %c0_i32_0 : i32, i32
  }
  func.func @transform_3(%arg0: i32, %arg1: i32) -> (i32, i32) {
    %c0_i32 = arith.constant 0 : i32
    %c0_i32_0 = arith.constant 0 : i32
    %c0_i32_1 = arith.constant 0 : i32
    return %c0_i32, %c0_i32_0 : i32, i32
  }
  func.func @transform_4(%arg0: i32, %arg1: i32) -> (i32, i32) {
    %c0_i32 = arith.constant 0 : i32
    %c0_i32_0 = arith.constant 0 : i32
    %c0_i32_1 = arith.constant 0 : i32
    return %c0_i32, %c0_i32_0 : i32, i32
  }
  func.func @transform_5(%arg0: i32, %arg1: i32) -> (i32, i32, i32) {
    %c0_i32 = arith.constant 0 : i32
    %c0_i32_0 = arith.constant 0 : i32
    return %arg0, %arg1, %c0_i32 : i32, i32, i32
  }
}

</mosaic_0001>

<bundles_post_ra>
// kernel: tpu_custom_call.1
= control target key start
LH: loop header
LB: loop body
LE: loop exit
PB: predicated region body
PF: predicated region fallthrough
CT: control target
= control target key end

     0   :  { %10 = vsyncpa [#allocation3], 0  ;;  %s1828_s0 = inlined_call_operand.vmem [shape: bf16[2,18,256], index: 0, kind: input, shape index: {}]   ;;  %s1829_s1 = inlined_call_operand.hbm [shape: bf16[768,128], index: 1, kind: input, shape index: {}]   ;;  %s1830_s2 = inlined_call_operand.vmem [shape: f32[1,128], index: 2, kind: input, shape index: {}]   ;;  %s1831_s3 = inlined_call_operand.hbm [shape: bf16[128,256], index: 3, kind: input, shape index: {}]   ;;  %s1832_s4 = inlined_call_operand.vmem [shape: f32[1,256], index: 4, kind: input, shape index: {}]   ;;  %s1833_s5 = inlined_call_operand.hbm [shape: f32[2,16,256], index: 5, kind: output, shape index: {}]  }
   0x1   :  { %11 = vsyncpa [#allocation6], 0 }
   0x2   :  { %12 = vsyncpa [#allocation4], 0 }
   0x3   :  { %14 = vsyncpa [#allocation4 + $0x1], 0  ;;  %s1622_s18 = smov 0   ;;  %s1624_s19 = smov 0  }
   0x4   :  { %s1626_s20 = smov 0   ;;  %s1628_s21 = smov 0  }
   0x5   :  { %s1630_s22 = smov 0   ;;  %s1632_s23 = smov 0  }
   0x6 LB: > { %s1125_s24 = sadd.s32 4294967295, %s1580_s23   ;;  %s1126_s25 = sadd.s32 4294967294, %s1580_s23   ;;  %s1580_s23 = sphi %s1632_s23, %s20_s23   ;;  %s1576_s22 = sphi %s1630_s22, %s1854_s22   ;;  %s1572_s21 = sphi %s1628_s21, %s1853_s21   ;;  %s1568_s20 = sphi %s1626_s20, %s1852_s20   ;;  %s1564_s19 = sphi %s1624_s19, %s1851_s19   ;;  %s1560_s18 = sphi %s1622_s18, %s1850_s18  }
   0x7   : > { %s32_s26 = sadd.s32 1, %s1576_s22  ;;  %s151_s27 = sadd.s32 1, %s1568_s20 }
   0x8   : > { %p34_p0 = scmp.ge.s32.totalorder %s32_s26, 2  ;;  %p161_p1 = scmp.ne.s32.totalorder %s1568_s20, %s1564_s19 }
   0x9   : > { %p162_p2 = scmp.eq.s32.totalorder %s1125_s24, 1  ;;  %p167_p3 = scmp.ne.s32.totalorder %s1564_s19, %s1560_s18 }
   0xa   : > { %s1856_s26 = smov (%p34_p0, %s32_s26), 0  ;;  %p168_p5 = scmp.eq.s32.totalorder %s1126_s25, 1 }
   0xb   : > { %1839 = sst [smem:[#allocation11_spill]] %s1856_s26  ;;  %p1662_p4 = por %p162_p2, %p161_p1 }
   0xc   : > { %s146_s29 = ssub.s32 %s1576_s22, %s1856_s26  ;;  %p1127_p6 = scmp.ge.s32.totalorder %s1580_s23, 1 }
   0xd   : > { %s1840_s28 = scalar_select %p1662_p4, 1, 0 }
   0xe   : > { %p149_p7 = scmp.eq.s32.totalorder %s146_s29, 0  ;;  %p1669_p8 = por %p168_p5, %p167_p3 }
   0xf   : > { %p175_p9 = scmp.lt.s32.totalorder %s1580_s23, 3  ;;  %p1681_p11 = scmp.eq.s32.totalorder %s1125_s24, 0 }
  0x10   : > { %s1841_s30 = scalar_select %p1669_p8, 1, 0 }
  0x11   : > { %s1675_s6 = scalar_select %p149_p7, %s1568_s20, %s151_s27  }
  0x12   : > { %p1677_p10 = pnand %p1127_p6, %p175_p9  ;;  %s1582_s9 = smov [#allocation2]  }
  0x13   : > { %s1843_s8 = scalar_select %p1681_p11, 1, 0 }
  0x14   : > { %s1842_s7 = scalar_select %p1677_p10, 1, 0 }
  0x15   : > { %p1288_p12 = pneg %p1677_p10  ;;  %s187_s10 = sshll.u32 %s1582_s9, 4  ;;  %s188_s10 = int_to_ptr.vmem [resolvable:$true] %s187_s10 }
  0x16   : > { %s1583_s12 = smov [#allocation5]   ;;  %s1438_s16 = scalar_lea.hbm %s1829_s1, 6144 }
  0x17   : > { %p1689_p13 = pnand %p1681_p11, %p1288_p12  ;;  %s203_s13 = sshll.u32 %s1583_s12, 4  ;;  %s1693_s13 = int_to_ptr.vmem [resolvable:$true] %s203_s13 }
  0x18   : > { %p1439_p0 = scmp.ne.s32.totalorder %s1829_s1, %s1438_s16  ;;  %p1445_p5 = scmp.lt.u32.totalorder %s1438_s16, %s1829_s1 }
  0x19   : > { %p1440_p1 = pneg %p1689_p13 }
  0x1b   : > { %p1441_p2 = pnand %p1440_p1, %p1439_p0 }
  0x1d   : > { %p1442_p3 = pneg %p1441_p2 }
  0x1f   : > { %p1447_p6 = pnand %p1445_p5, %p1442_p3 }
  0x21   : > { %1450 = shalt.err (!%p1447_p6)
}
  0x22   : > { %s1451_s29 = scalar_lea.vmem %s188_s10, 6144  ;;  %p1459_p8 = scmp.lt.s32.totalorder %s188_s10, %s188_s10 }
  0x23   : > { %p1452_p7 = scmp.ne.s32.totalorder %s188_s10, %s1451_s29  ;;  %p1460_p4 = scmp.lt.s32.totalorder %s1451_s29, %s1451_s29 }
  0x25   : > { %p1454_p9 = pnand %p1452_p7, %p1440_p1  ;;  %p1461_p11 = por %p1460_p4, %p1459_p8 }
  0x27   : > { %p1455_p12 = pneg %p1454_p9 }
  0x29   : > { %p1462_p10 = pnand %p1461_p11, %p1455_p12 }
  0x2b   : > { %1465 = shalt.err (!%p1462_p10)
}
  0x2c   : > { %s1584_s9 = smov 64   ;;  %s1585_s12 = smov 4  }
  0x2d   : > { %1291 = dma.hbm_to_vmem [thread:$0]  (!%p1689_p13), %s1829_s1, 6144, %s188_s10, [#allocation3], %s1584_s9, %s1584_s9, %s1585_s12  }
  0x2e   : > { %s1466_s24 = scalar_lea.hbm %s1831_s3, 2048 }
  0x2f   : > { %p1467_p0 = scmp.ne.s32.totalorder %s1831_s3, %s1466_s24  ;;  %p1473_p10 = scmp.lt.u32.totalorder %s1466_s24, %s1831_s3 }
  0x31   : > { %p1469_p4 = pnand %p1467_p0, %p1440_p1 }
  0x33   : > { %p1470_p8 = pneg %p1469_p4 }
  0x35   : > { %p1475_p11 = pnand %p1473_p10, %p1470_p8 }
  0x37   : > { %1478 = shalt.err (!%p1475_p11)
}
  0x38   : > { %s1479_s10 = scalar_lea.vmem %s1693_s13, 2048  ;;  %p1487_p6 = scmp.lt.s32.totalorder %s1693_s13, %s1693_s13 }
  0x39   : > { %p1480_p2 = scmp.ne.s32.totalorder %s1693_s13, %s1479_s10  ;;  %p1488_p7 = scmp.lt.s32.totalorder %s1479_s10, %s1479_s10 }
  0x3b   : > { %p1482_p3 = pnand %p1480_p2, %p1440_p1  ;;  %p1489_p9 = por %p1488_p7, %p1487_p6 }
  0x3d   : > { %p1483_p5 = pneg %p1482_p3 }
  0x3f   : > { %p1490_p12 = pnand %p1489_p9, %p1483_p5 }
  0x41   : > { %1493 = shalt.err (!%p1490_p12)
}
  0x42   : > { %s1586_s26 = smov 128   ;;  %s1587_s9 = smov 8  }
  0x43   : > { %1294 = dma.hbm_to_vmem [thread:$0]  (!%p1689_p13), %s1831_s3, 2048, %s1693_s13, [#allocation6], %s1586_s26, %s1586_s26, %s1587_s9  }
  0x44   : > { %p1845_p0 = scmp.ne.s32.totalorder %s1842_s7, 0 }
  0x45   : > { %p1846_p1 = scmp.ne.s32.totalorder (!%p1845_p0), %s1843_s8, 0 }
  0x46   : > { %230 = sbr.rel (%p1845_p0) target bundleno = 606 (0x25e), region = 40 }
  0x4d   : > { %1547 = dma.done.wait (%p1846_p1), [#allocation3], 6144  }
  0x4e   : > { %1549 = vsyncadd (%p1846_p1), [#allocation3], 4294961152 }
  0x4f   : > { %1551 = dma.done.wait (%p1846_p1), [#allocation6], 2048  }
  0x50   : > { %1553 = vsyncadd (%p1846_p1), [#allocation6], 4294965248  ;;  %v1361_v0 = vld [vmem:[#allocation2 + $0x40] sm:$0xff]   ;;  %v1365_v4 = vld [vmem:[#allocation2 + $0x48] sm:$0xff]   ;;  %p262_p13 = scmp.lt.s32.totalorder %s1572_s21, 1  ;;  %vm320_vm1 = vcmask 1046528  }
  0x51   : > { %v1362_v1 = vld [vmem:[#allocation2] sm:$0xff]   ;;  %1211 = vmatprep.subr.bf16.mxu0 %v1361_v0  ;;  %v1366_v5 = vld [vmem:[#allocation2 + $0x8] sm:$0xff]   ;;  %v1369_v8 = vld [vmem:[#allocation2 + $0x50] sm:$0xff]   ;;  %vm293_vm0 = vsmask.f32 7424  ;;  %s259_s27 = sand.u32 1, %s1564_s19  }
  0x52   : > { %v1363_v2 = vld [vmem:[#allocation2 + $0xc0] sm:$0xff]   ;;  %1212 = vmatpush3.bf16.msra.mxu0 %v1362_v1  ;;  %v1367_v6 = vld [vmem:[#allocation2 + $0xc8] sm:$0xff]   ;;  %v1370_v9 = vld [vmem:[#allocation2 + $0x10] sm:$0xff]   ;;  %s263_s7 = scalar_select %p262_p13, %s1572_s21, 1 }
  0x53   : > { %v1364_v3 = vld [vmem:[#allocation2 + $0x80] sm:$0xff]   ;;  %1233 = vmatprep.subr.bf16.mxu1 %v1363_v2  ;;  %1213 = vmatprep.subr.bf16.mxu0 %v1365_v4  ;;  %v1368_v7 = vld [vmem:[#allocation2 + $0x88] sm:$0xff]   ;;  %v1371_v10 = vld [vmem:[#allocation2 + $0xd0] sm:$0xff]   ;;  %s1134_s29 = sshll.u32 %s259_s27, 5  ;;  %s1210_s9 = sshll.u32 %s1572_s21, 9 }
  0x54   : > { %1234 = vmatpush3.bf16.msra.mxu1 %v1364_v3  ;;  %v1372_v11 = vld [vmem:[#allocation2 + $0x90] sm:$0xff]   ;;  %v1373_v12 = vld [vmem:[#allocation2 + $0x58] sm:$0xff]   ;;  %v1377_v16 = vld [vmem:[#allocation2 + $0x60] sm:$0xff]   ;;  %s1277_s8 = smul.u32 24, %s263_s7  ;;  %s261_s10 = scalar_lea.vmem [#allocation7], %s1134_s29 }
  0x55   : > { %1235 = vmatprep.subr.bf16.mxu1 %v1367_v6  ;;  %v1374_v13 = vld [vmem:[#allocation2 + $0x18] sm:$0xff]   ;;  %v1378_v17 = vld [vmem:[#allocation2 + $0x20] sm:$0xff]   ;;  %v1381_v20 = vld [vmem:[#allocation2 + $0x68] sm:$0xff]   ;;  %s1028_s26 = sshll.u32 %s261_s10, 4  ;;  %s1780_s7 = scalar_lea.hbm %s1833_s5, %s1210_s9  ;;  %s1775_s26 = int_to_ptr.vmem [resolvable:$true] %s1028_s26 }
  0x56   : > { %1214 = vmatpush3.bf16.msra.mxu0 %v1366_v5  ;;  %v1375_v14 = vld [vmem:[#allocation2 + $0xd8] sm:$0xff]   ;;  %v1379_v18 = vld [vmem:[#allocation2 + $0xe0] sm:$0xff]   ;;  %v1382_v21 = vld [vmem:[#allocation2 + $0x28] sm:$0xff]   ;;  %s266_s15 = scalar_lea.vmem %s1828_s0, %s1277_s8  ;;  %s1782_s8 = scalar_lea.sflag [#allocation4], %s259_s27 }
  0x57   : > { %1215 = vmatprep.subr.bf16.mxu0 %v1369_v8  ;;  %v1376_v15 = vld [vmem:[#allocation2 + $0x98] sm:$0xff]   ;;  %v1380_v19 = vld [vmem:[#allocation2 + $0xa0] sm:$0xff]   ;;  %v1383_v22 = vld [vmem:[#allocation2 + $0xe8] sm:$0xff]   ;;  %s1494_s21 = scalar_lea.vmem %s1775_s26, 512  ;;  %p1847_p8 = scmp.ne.s32.totalorder %s1840_s28, 0 }
  0x58   : > { %1236 = vmatpush3.bf16.msra.mxu1 %v1368_v7  ;;  %v1384_v23 = vld [vmem:[#allocation2 + $0xa8] sm:$0xff]   ;;  %v1385_v24 = vld [vmem:[#allocation2 + $0x70] sm:$0xff]   ;;  %v1389_v28 = vld [vmem:[#allocation2 + $0x78] sm:$0xff]   ;;  %p1495_p4 = scmp.ne.s32.totalorder %s1775_s26, %s1494_s21  ;;  %s1589_s11 = smov [#allocation7]  }
  0x59   : > { %1237 = vmatprep.subr.bf16.mxu1 %v1371_v10  ;;  %v1386_v25 = vld [vmem:[#allocation2 + $0x30] sm:$0xff]   ;;  %v1390_v29 = vld [vmem:[#allocation2 + $0x38] sm:$0xff]   ;;  %v1392_v31 = vld [vmem:[%s266_s15 + $0x4] ss:$8 sps:$4 sm:$0xff]   ;;  %s1498_s13 = sshll.u32 %s1589_s11, 4  ;;  %s1499_s13 = int_to_ptr.vmem [resolvable:$false] %s1498_s13 }
  0x5a   : > { %1216 = vmatpush3.bf16.msra.mxu0 %v1370_v9  ;;  %v1387_v26 = vld [vmem:[#allocation2 + $0xf0] sm:$0xff]   ;;  %v1391_v30 = vld [vmem:[#allocation2 + $0xf8] sm:$0xff]   ;;  %752 = vmatprep.mubr.bf16.mxu0 %v1392_v31  ;;  %v1757_v33 = vld [vmem:[%s266_s15] ss:$8 sps:$4 sm:$0xff]   ;;  %v307_v36 = vshrl.u32 %v1392_v31, 16  ;;  %v309_v37 = vshll.u32 %v1392_v31, 16  ;;  %p1496_p10 = pnand %p1495_p4, %p1847_p8  ;;  %p1501_p2 = scmp.lt.s32.totalorder %s1775_s26, %s1499_s13 }
  0x5b   : > { %1217 = vmatprep.subr.bf16.mxu0 %v1373_v12  ;;  %v1388_v27 = vld [vmem:[#allocation2 + $0xb0] sm:$0xff]   ;;  %v1394_v32 = vld [vmem:[#allocation2 + $0xb8] sm:$0xff]   ;;  %v1396_v34 = vld [vmem:[#allocation2 + $0x140] sm:$0xff]   ;;  %v295_v41 = vshrl.u32 %v1757_v33, 16  ;;  %v297_v42 = vshll.u32 %v1757_v33, 16  ;;  %v324_v57 = vrot.slane %v1392_v31, 1 }
  0x5c   : > { %1238 = vmatpush3.bf16.msra.mxu1 %v1372_v11  ;;  %v277_v35 = vld [vmem:[%s266_s15 + $0x10] sm:$0x11]  ;;  %v1398_v38 = vld [vmem:[#allocation2 + $0x100] sm:$0xff]   ;;  %v311_v43 = vrot.slane %v309_v37, 1  ;;  %v1400_v44 = vld [vmem:[#allocation2 + $0x148] sm:$0xff]   ;;  %v321_v6 = vrot.slane %v1757_v33, 1  ;;  %p1497_p11 = pneg %p1496_p10 }
  0x5d   : > { %1239 = vmatprep.subr.bf16.mxu1 %v1375_v14  ;;  %v1139_v39 = vcombine.high %v277_v35, %v277_v35  ;;  %v1138_v40 = vcombine.low %v277_v35, %v277_v35  ;;  %v299_v46 = vrot.slane %v297_v42, 1  ;;  %v1401_v48 = vld [vmem:[#allocation2 + $0x108] sm:$0xff]   ;;  %v1402_v53 = vld [vmem:[#allocation2 + $0x150] sm:$0xff]   ;;  %v1404_v58 = vld [vmem:[#allocation2 + $0x158] sm:$0xff]   ;;  %s1500_s15 = scalar_lea.vmem %s1499_s13, 1024 }
  0x5e   : > { %1218 = vmatpush3.bf16.msra.mxu0 %v1374_v13  ;;  %v312_v49 = vor.u32 %v311_v43, %v307_v36  ;;  %v1403_v56 = vld [vmem:[#allocation2 + $0x110] sm:$0xff]   ;;  %v1405_v61 = vld [vmem:[#allocation2 + $0x118] sm:$0xff]   ;;  %v1406_v62 = vld [vmem:[#allocation2 + $0x160] sm:$0xff]   ;;  %p1502_p3 = scmp.lt.s32.totalorder %s1500_s15, %s1494_s21 }
  0x5f   : > { %1219 = vmatprep.subr.bf16.mxu0 %v1377_v16  ;;  %v314_v45 = vshll.u32 %v1139_v39, 16  ;;  %v302_v47 = vshll.u32 %v1138_v40, 16  ;;  %v300_v51 = vor.u32 %v299_v46, %v295_v41  ;;  %v325_v59 = vrot.slane %v1139_v39, 1  ;;  %v1407_v63 = vld [vmem:[#allocation2 + $0x120] sm:$0xff]   ;;  %v1408_v0 = vld [vmem:[#allocation2 + $0x168] sm:$0xff]   ;;  %v1410_v2 = vld [vmem:[#allocation2 + $0x170] sm:$0xff]  }
  0x60   : > { %1240 = vmatpush3.bf16.msra.mxu1 %v1376_v15  ;;  %v1409_v1 = vld [vmem:[#allocation2 + $0x128] sm:$0xff]   ;;  %v1411_v3 = vld [vmem:[#allocation2 + $0x130] sm:$0xff]   ;;  %v1412_v4 = vld [vmem:[#allocation2 + $0x178] sm:$0xff]   ;;  %v322_v7 = vrot.slane %v1138_v40, 1  ;;  %p1503_p5 = por %p1502_p3, %p1501_p2 }
  0x61   : > { %1241 = vmatprep.subr.bf16.mxu1 %v1379_v18  ;;  %v316_v50 = vrot.slane %v314_v45, 1  ;;  %v304_v52 = vrot.slane %v302_v47, 1  ;;  %v326_v60 = vsel %vm320_vm1, %v324_v57, %v325_v59  ;;  %v1413_v5 = vld [vmem:[#allocation2 + $0x138] sm:$0xff]   ;;  %v1414_v9 = vld [vmem:[#allocation5] ss:$8 sps:$4 sm:$0xff]  }
  0x62   : > { %1220 = vmatpush3.bf16.msra.mxu0 %v1378_v17  ;;  %v323_v8 = vsel %vm320_vm1, %v321_v6, %v322_v7  ;;  %v1416_v10 = vld [vmem:[#allocation5 + $0x4] ss:$8 sps:$4 sm:$0xff]   ;;  %v1419_v11 = vld [vmem:[#allocation5 + $0x14] ss:$8 sps:$4 sm:$0xff]   ;;  %v1417_v12 = vld [vmem:[#allocation5 + $0x10] ss:$8 sps:$4 sm:$0xff]   ;;  %p1504_p6 = pnand %p1503_p5, %p1497_p11 }
  0x63   : > { %1221 = vmatprep.subr.bf16.mxu0 %v1381_v20  ;;  %v317_v54 = vsel %vm293_vm0, %v312_v49, %v316_v50  ;;  %v305_v55 = vsel %vm293_vm0, %v300_v51, %v304_v52  ;;  %v1422_v13 = vld [vmem:[#allocation5 + $0x24] ss:$8 sps:$4 sm:$0xff]   ;;  %v1420_v14 = vld [vmem:[#allocation5 + $0x20] ss:$8 sps:$4 sm:$0xff]   ;;  %v1425_v15 = vld [vmem:[#allocation5 + $0x34] ss:$8 sps:$4 sm:$0xff]  }
  0x64   : > { %1242 = vmatpush3.bf16.msra.mxu1 %v1380_v19  ;;  %793 = vmatprep.mubr.bf16.mxu1 %v317_v54  ;;  %v1423_v16 = vld [vmem:[#allocation5 + $0x30] ss:$8 sps:$4 sm:$0xff]   ;;  %v1428_v17 = vld [vmem:[#allocation5 + $0x44] ss:$8 sps:$4 sm:$0xff]   ;;  %v1426_v18 = vld [vmem:[#allocation5 + $0x40] ss:$8 sps:$4 sm:$0xff]  }
  0x65   : > { %1243 = vmatprep.subr.bf16.mxu1 %v1383_v22  ;;  %v1431_v19 = vld [vmem:[#allocation5 + $0x54] ss:$8 sps:$4 sm:$0xff]   ;;  %v1429_v20 = vld [vmem:[#allocation5 + $0x50] ss:$8 sps:$4 sm:$0xff]   ;;  %v1432_v22 = vld [vmem:[#allocation5 + $0x60] ss:$8 sps:$4 sm:$0xff]  }
  0x66   : > { %1222 = vmatpush3.bf16.msra.mxu0 %v1382_v21  ;;  %v1434_v21 = vld [vmem:[#allocation5 + $0x64] ss:$8 sps:$4 sm:$0xff]   ;;  %v864_v59 = vld [vmem:[%s1832_s4] sm:$0x3] }
  0x67   : > { %1223 = vmatprep.subr.bf16.mxu0 %v1385_v24  ;;  %v1437_v24 = vld [vmem:[#allocation5 + $0x74] ss:$8 sps:$4 sm:$0xff]  }
  0x68   : > { %1244 = vmatpush3.bf16.msra.mxu1 %v1384_v23  ;;  %v1435_v23 = vld [vmem:[#allocation5 + $0x70] ss:$8 sps:$4 sm:$0xff]  }
  0x69   : > { %1245 = vmatprep.subr.bf16.mxu1 %v1387_v26 }
  0x6a   : > { %1224 = vmatpush3.bf16.msra.mxu0 %v1386_v25  ;;  %v1588_v25 = vmov 0  }
  0x6b   : > { %1225 = vmatprep.subr.bf16.mxu0 %v1389_v28 }
  0x6c   : > { %1246 = vmatpush3.bf16.msra.mxu1 %v1388_v27 }
  0x6d   : > { %1247 = vmatprep.subr.bf16.mxu1 %v1391_v30 }
  0x6e   : > { %1226 = vmatpush3.bf16.msra.mxu0 %v1390_v29 }
  0x6f   : > { %1255 = vmatprep.subr.bf16.mxu0 %v1396_v34 }
  0x70   : > { %1248 = vmatpush3.bf16.msra.mxu1 %v1394_v32  ;;  %v1140_v32 = vld [vmem:[%s1830_s2] ss:$0 sm:$0xff] }
  0x71   : > { %753 = vmatmul.mubr.bf16.vlgmr.msra.gmra.mrb[0].mxu0 %v1757_v33  ;;  %956 = vmatprep.subr.bf16.mxu1 %v1416_v10 }
  0x72   : > { %1256 = vmatpush3.bf16.msra.mxu0 %v1398_v38  ;;  %834 = vmatprep.mubr.bf16.mxu0 %v326_v60 }
  0x73   : > { %1257 = vmatprep.subr.bf16.mxu0 %v1400_v44  ;;  %794 = vmatmul.mubr.bf16.vlgmr.msra.gmra.mrb[0].mxu1 %v305_v55 }
  0x74   : > { %957 = vmatpush1.bf16.msra.mxu1 %v1414_v9  ;;  %988 = vmatprep.mubr.bf16.mxu1 %v1588_v25 }
  0x75   : > { %958 = vmatprep.subr.bf16.mxu1 %v1419_v11 }
  0x76   : > { %1258 = vmatpush3.bf16.msra.mxu0 %v1401_v48 }
  0x77   : > { %1259 = vmatprep.subr.bf16.mxu0 %v1402_v53 }
  0x78   : > { %959 = vmatpush1.bf16.msra.mxu1 %v1417_v12 }
  0x79   : > { %960 = vmatprep.subr.bf16.mxu1 %v1422_v13 }
  0x7a   : > { %1260 = vmatpush3.bf16.msra.mxu0 %v1403_v56  ;;  %v866_v56 = vlaneseq }
  0x7b   : > { %1261 = vmatprep.subr.bf16.mxu0 %v1404_v58 }
  0x7c   : > { %961 = vmatpush1.bf16.msra.mxu1 %v1420_v14  ;;  %v867_v57 = vshrl.u32 %v866_v56, 7 }
  0x7d   : > { %962 = vmatprep.subr.bf16.mxu1 %v1425_v15 }
  0x7e   : > { %1262 = vmatpush3.bf16.msra.mxu0 %v1405_v61  ;;  %v868_v58 = vsub.s32 0, %v867_v57  ;;  %v872_v60 = vsub.s32 1, %v867_v57 }
  0x7f   : > { %1263 = vmatprep.subr.bf16.mxu0 %v1406_v62 }
  0x80   : > { %963 = vmatpush1.bf16.msra.mxu1 %v1423_v16  ;;  %v869_v61 = vrot.slane %v864_v59, %v868_v58  ;;  %v873_v62 = vrot.slane %v864_v59, %v872_v60 }
  0x81   : > { %964 = vmatprep.subr.bf16.mxu1 %v1428_v17 }
  0x82   : > { %1264 = vmatpush3.bf16.msra.mxu0 %v1407_v63 }
  0x83   : > { %1265 = vmatprep.subr.bf16.mxu0 %v1408_v0 }
  0x84   : > { %965 = vmatpush1.bf16.msra.mxu1 %v1426_v18 }
  0x85   : > { %966 = vmatprep.subr.bf16.mxu1 %v1431_v19 }
  0x86   : > { %1266 = vmatpush3.bf16.msra.mxu0 %v1409_v1 }
  0x87   : > { %1267 = vmatprep.subr.bf16.mxu0 %v1410_v2 }
  0x88   : > { %967 = vmatpush1.bf16.msra.mxu1 %v1429_v20 }
  0x89   : > { %968 = vmatprep.subr.bf16.mxu1 %v1434_v21 }
  0x8a   : > { %1268 = vmatpush3.bf16.msra.mxu0 %v1411_v3 }
  0x8b   : > { %1269 = vmatprep.subr.bf16.mxu0 %v1412_v4 }
  0x8c   : > { %969 = vmatpush1.bf16.msra.mxu1 %v1432_v22 }
  0x8d   : > { %970 = vmatprep.subr.bf16.mxu1 %v1437_v24 }
  0x8e   : > { %1270 = vmatpush3.bf16.msra.mxu0 %v1413_v5 }
  0x90   : > { %971 = vmatpush1.bf16.msra.mxu1 %v1435_v23 }
  0x91   : > { %835 = vmatmul.mubr.bf16.vlgmr.msra.gmra.mrb[4].mxu0 %v323_v8 }
 0x144   : > { %v1227_v26 = vpop.f32.mrb[0].mxu0 }
 0x145   : > { %v1228_v27 = vpop.f32.mrb[1].mxu0 }
 0x146   : > { %v1229_v28 = vadd.f32 %v1228_v27, %v1227_v26  ;;  %v1230_v29 = vpop.f32.mrb[2].mxu0  ;;  %v1249_v34 = vpop.f32.mrb[0].mxu1 }
 0x147   : > { %v1231_v30 = vpop.f32.mrb[3].mxu0  ;;  %v1250_v35 = vpop.f32.mrb[1].mxu1 }
 0x148   : > { %v1232_v31 = vadd.f32 %v1231_v30, %v1230_v29  ;;  %v755_v33 = vadd.f32 %v1229_v28, %v1140_v32  ;;  %v1251_v37 = vadd.f32 %v1250_v35, %v1249_v34  ;;  %v1252_v38 = vpop.f32.mrb[2].mxu1 }
 0x149   : > { %v1253_v39 = vpop.f32.mrb[3].mxu1 }
 0x14a   : > { %v758_v36 = vadd.f32 %v1232_v31, %v1140_v32  ;;  %v796_v40 = vadd.f32 %v1251_v37, %v755_v33  ;;  %v1254_v41 = vadd.f32 %v1253_v39, %v1252_v38 }
 0x14c   : > { %v799_v42 = vadd.f32 %v1254_v41, %v758_v36 }
 0x164   : > { %v1271_v43 = vpop.f32.mrb[4].mxu0 }
 0x165   : > { %v1272_v44 = vpop.f32.mrb[5].mxu0 }
 0x166   : > { %v1273_v45 = vadd.f32 %v1272_v44, %v1271_v43  ;;  %v1274_v46 = vpop.f32.mrb[6].mxu0 }
 0x167   : > { %v1275_v47 = vpop.f32.mrb[7].mxu0 }
 0x168   : > { %v837_v48 = vadd.f32 %v1273_v45, %v796_v40  ;;  %v1276_v49 = vadd.f32 %v1275_v47, %v1274_v46 }
 0x16a   : > { %v843_v50 = vmax.f32 %v837_v48, 0.0  ;;  %v840_v51 = vadd.f32 %v1276_v49, %v799_v42 }
 0x16c   : > { %v844_v52 = vmax.f32 %v840_v51, 0.0  ;;  %v845_v53 = vmin.f32 %v843_v50, 6.0 }
 0x16e   : > { %v846_v54 = vmin.f32 %v844_v52, 6.0 }
 0x170   : > { %v847_v55 = vpack.c.bf16 %v846_v54, %v845_v53 }
 0x172   : > { %989 = vmatmul.mubr.bf16.vlgmr.msra.gmra.mrb[4].mxu1 %v847_v55 }
 0x245   : > { %v990_v63 = vpop.f32.mrb[4].mxu1 }
 0x246   : > { %v991_v0 = vadd.f32 %v990_v63, %v869_v61  ;;  %v992_v1 = vpop.f32.mrb[5].mxu1 }
 0x247   : > { %v993_v2 = vadd.f32 %v992_v1, %v873_v62  ;;  %v994_v3 = vpop.f32.mrb[6].mxu1 }
 0x248   : > { %v999_v4 = vmax.f32 %v991_v0, 0.0  ;;  %v995_v5 = vadd.f32 %v994_v3, %v869_v61  ;;  %v996_v6 = vpop.f32.mrb[7].mxu1 }
 0x249   : > { %v1000_v7 = vmax.f32 %v993_v2, 0.0  ;;  %v997_v8 = vadd.f32 %v996_v6, %v873_v62 }
 0x24a   : > { %v1003_v9 = vmin.f32 %v999_v4, 6.0  ;;  %v1001_v10 = vmax.f32 %v995_v5, 0.0 }
 0x24b   : > { %v1004_v11 = vmin.f32 %v1000_v7, 6.0  ;;  %v1002_v12 = vmax.f32 %v997_v8, 0.0 }
 0x24c   : > { %1007 = vst [vmem:[%s261_s10] sm:$0xff] %v1003_v9  ;;  %v1005_v13 = vmin.f32 %v1001_v10, 6.0 }
 0x24d   : > { %1008 = vst [vmem:[%s261_s10 + $0x8] sm:$0xff] %v1004_v11  ;;  %v1006_v14 = vmin.f32 %v1002_v12, 6.0 }
 0x24e   : > { %1009 = vst [vmem:[%s261_s10 + $0x10] sm:$0xff] %v1005_v13 }
 0x24f   : > { %1010 = vst [vmem:[%s261_s10 + $0x18] sm:$0xff] %v1006_v14 }
 0x250   : > { %1507 = shalt.err (!%p1504_p6)
}
 0x251   : > { %s1508_s16 = scalar_lea.hbm %s1780_s7, 512  ;;  %s1512_s25 = scalar_lea.hbm %s1833_s5, 1024 }
 0x252   : > { %p1509_p7 = scmp.ne.s32.totalorder %s1780_s7, %s1508_s16  ;;  %p1513_p0 = scmp.lt.u32.totalorder %s1780_s7, %s1833_s5 }
 0x253   : > { %p1514_p1 = scmp.lt.u32.totalorder %s1512_s25, %s1508_s16  ;;  %p1516_p4 = scmp.lt.u32.totalorder %s1508_s16, %s1780_s7 }
 0x254   : > { %p1510_p9 = pnand %p1509_p7, %p1847_p8 }
 0x255   : > { %p1515_p13 = por %p1514_p1, %p1513_p0 }
 0x256   : > { %p1511_p12 = pneg %p1510_p9 }
 0x257   : > { %p1517_p10 = por %p1516_p4, %p1515_p13 }
 0x259   : > { %p1518_p11 = pnand %p1517_p10, %p1511_p12 }
 0x25b   : > { %1521 = shalt.err (!%p1518_p11)
}
 0x25c   : > { %s1590_s10 = smov 256   ;;  %s1591_s9 = smov 16  }
 0x25d   : > { %1286 = dma.vmem_to_hbm [thread:$0]  (%p1847_p8), %s1775_s26, 512, %s1780_s7, %s1782_s8, %s1590_s10, %s1590_s10, %s1591_s9  }
 0x25e PF: > { %p1303_p2 = scmp.ge.s32.totalorder %s1580_s23, 2  ;;  %s1043_s12 = sand.u32 1, %s1560_s18  }
 0x25f   : > { %p1848_p3 = scmp.ne.s32.totalorder %s1841_s30, 0  ;;  %s1044_s14 = scalar_lea.sflag [#allocation4], %s1043_s12 }
 0x261   : > { %p1296_p5 = pnand %p1303_p2, %p1848_p3 }
 0x263   : > { %1555 = dma.done.wait (!%p1296_p5), %s1044_s14, 512  }
 0x264   : > { %1557 = vsyncadd (!%p1296_p5), %s1044_s14, 4294966784  ;;  %s20_s23 = sadd.s32 1, %s1580_s23   ;;  %s1849_s28 = sld [smem:[#allocation11_spill]] }
 0x265   : > { %p17_p6 = scmp.ge.s32.totalorder %s20_s23, 4   ;;  %s1850_s18 = smov %s1564_s19 }
 0x266   : > { %s1851_s19 = smov %s1568_s20  ;;  %s1852_s20 = smov %s1675_s6 }
 0x267   : > { %s1853_s21 = smov %s1576_s22  ;;  %19 = sbr.rel (!%p17_p6) target bundleno = 6 (0x6), region = 85 }
 0x26a   : > { %s1854_s22 = smov %s1849_s28 }
 0x26e   :  { %1049 = vsyncpa [#allocation3], 1 }
 0x26f   :  { %1051 = vsyncpa [#allocation3 + $0x1], 1 }
 0x270   :  { %1052 = vsyncpa [#allocation6], 1 }
 0x271   :  { %1053 = vsyncpa [#allocation4], 1 }
 0x272   :  { %1055 = vsyncpa [#allocation4 + $0x1], 1 }

</bundles_post_ra>
